<compile_context>
chip_gen: v7x
topology: tpu7x:2x2x1
jax: 0.10.0
libtpu: 0.0.40
codegen_flags: <defaults>
</compile_context>

<pallas_src>
import functools

import jax
import jax.numpy as jnp
from jax.experimental import pallas as pl
from jax.experimental.pallas import tpu as pltpu

NUM_POLICIES = 10
LANE = 128          # lane width: feature axes (H, O) are padded to this


def _round_up(n, m=LANE):
    return ((n + m - 1) // m) * m


def _pad2(a, rows, cols):
    r, c = a.shape
    return jnp.pad(a, ((0, rows - r), (0, cols - c)))


def master_policy_kernel(x_ref, w1_ref, b1_ref, w2_ref, b2_ref,
                         w3_ref, b3_ref, probs_ref):
    # Grid-less call: every ref is the whole array, already resident in VMEM.
    x = x_ref[...].astype(jnp.bfloat16)        # (B, S)      bf16 for the MXU
    b1 = b1_ref[...]                           # (1, H_pad)  f32
    b2 = b2_ref[...]                           # (1, H_pad)  f32
    b3 = b3_ref[...]                           # (1, O_pad)  f32

    # fc1 + relu   (bf16 operands, f32 accumulation on the MXU)
    h1 = jnp.dot(x, w1_ref[...], preferred_element_type=jnp.float32)
    h1 = jnp.maximum(h1 + b1, 0.0)             # (B, H_pad)

    # fc2 + relu
    h2 = jnp.dot(h1.astype(jnp.bfloat16), w2_ref[...],
                 preferred_element_type=jnp.float32)
    h2 = jnp.maximum(h2 + b2, 0.0)             # (B, H_pad)

    # out
    logits = jnp.dot(h2.astype(jnp.bfloat16), w3_ref[...],
                     preferred_element_type=jnp.float32) + b3   # (B, O_pad)

    # softmax over dim=0 (leading axis, as written in the PyTorch module),
    # numerically stable.  Normalization uses an EXACT divide: the denominator
    # is only a (1, O_pad) vector so the cost is negligible, and every column
    # sums to 1 up to f32 rounding (required for a Categorical sampler).
    z = logits - jnp.max(logits, axis=0, keepdims=True)
    e = jnp.exp(z)
    inv = 1.0 / jnp.sum(e, axis=0, keepdims=True)
    probs_ref[...] = e * inv                   # (B, O_pad) lane-dense store


@functools.partial(jax.jit, static_argnames=("output_size",))
def master_policy_forward(x, padded_params, output_size):
    """x: (B, S) float32 at its natural (unpadded) shape.

    padded_params: lane-padded bf16 weights (stored as W^T, shape (in, out))
    and f32 biases.  Returns softmax(logits, axis=0)[:, :output_size].
    The pallas_call and the O_pad -> output_size slice share this one jit, so
    the whole forward is a single dispatch with no wrapper pad/slice HLOs.
    """
    B = x.shape[0]
    O_pad = padded_params["w3"].shape[1]

    probs_pad = pl.pallas_call(
        master_policy_kernel,
        out_shape=jax.ShapeDtypeStruct((B, O_pad), jnp.float32),
        # No grid: every operand is a single whole-array VMEM block (default
        # BlockSpec) copied in exactly once -> no pipeline bookkeeping and no
        # double-buffering for grid-invariant weights.
        compiler_params=pltpu.CompilerParams(
            vmem_limit_bytes=4 * 1024 * 1024,   # actual footprint ~100 KB
        ),
    )(x,
      padded_params["w1"], padded_params["b1"],
      padded_params["w2"], padded_params["b2"],
      padded_params["w3"], padded_params["b3"])

    # Padded output columns hold softmax of all-zero logits; slice them off
    # here (inside the same jit / dispatch).
    return probs_pad[:, :output_size]


def init_params(key, state_size, hidden_size, output_size=NUM_POLICIES):
    """Deterministic synthetic parameters (Linear shapes from __init__),
    stored as W^T with shape (in, out) and biases as (1, out), float32."""
    ks = jax.random.split(key, 6)
    scale = 0.1
    w1 = scale * jax.random.normal(ks[0], (state_size, hidden_size), jnp.float32)
    b1 = scale * jax.random.normal(ks[1], (1, hidden_size), jnp.float32)
    w2 = scale * jax.random.normal(ks[2], (hidden_size, hidden_size), jnp.float32)
    b2 = scale * jax.random.normal(ks[3], (1, hidden_size), jnp.float32)
    w3 = scale * jax.random.normal(ks[4], (hidden_size, output_size), jnp.float32)
    b3 = scale * jax.random.normal(ks[5], (1, output_size), jnp.float32)
    return {"w1": w1, "b1": b1, "w2": w2, "b2": b2, "w3": w3, "b3": b3}


def pad_params(p, compute_dtype=jnp.bfloat16):
    """One-time prep (outside the per-call path): zero-pad H/O feature axes up
    to 128 lanes and store weights in bf16 (MXU-native).  S stays unpadded so
    x can be passed at its natural shape.  Biases stay f32 (added after the
    f32 accumulation).  Zero padding is contamination-free."""
    S, H = p["w1"].shape
    O = p["w3"].shape[1]
    H_pad, O_pad = _round_up(H), _round_up(O)
    return {
        "w1": _pad2(p["w1"], S, H_pad).astype(compute_dtype),
        "b1": _pad2(p["b1"], 1, H_pad),
        "w2": _pad2(p["w2"], H_pad, H_pad).astype(compute_dtype),
        "b2": _pad2(p["b2"], 1, H_pad),
        "w3": _pad2(p["w3"], H_pad, O_pad).astype(compute_dtype),
        "b3": _pad2(p["b3"], 1, O_pad),
    }


def reference_forward(x, p):
    """Pure-JAX float32 reference matching the PyTorch module."""
    h1 = jnp.maximum(x @ p["w1"] + p["b1"], 0.0)
    h2 = jnp.maximum(h1 @ p["w2"] + p["b2"], 0.0)
    logits = h2 @ p["w3"] + p["b3"]
    return jax.nn.softmax(logits, axis=0)


if __name__ == "__main__":
    key = jax.random.PRNGKey(0)
    k_x, k_p = jax.random.split(key)

    B, S, H, O = 8, 16, 32, NUM_POLICIES
    x = jax.random.normal(k_x, (B, S), jnp.float32)
    params = init_params(k_p, S, H, O)
    padded = pad_params(params)          # one-time, outside the per-call path

    probs = master_policy_forward(x, padded, output_size=O)
    probs = jax.block_until_ready(probs)

    ref = reference_forward(x, params)
    assert probs.shape == (B, O)
    # bf16 weights/activations vs f32 reference -> slightly loosened tolerance
    assert jnp.allclose(probs, ref, atol=5e-3, rtol=5e-3)
    # exact normalization: every dim=0 softmax column sums to 1 (f32 rounding)
    assert jnp.allclose(jnp.sum(probs, axis=0), jnp.ones((O,)), atol=1e-5)
    assert bool(jnp.all(probs >= 0.0))

    print("KERNEL_OK")
</pallas_src>

<mosaic_0001>
module attributes {stable_mosaic.version = 11 : i64} {
  func.func @master_policy_kernel(%arg0: memref<8x16xf32, #tpu.memory_space<vmem>>, %arg1: memref<16x128xbf16, #tpu.memory_space<vmem>>, %arg2: memref<1x128xf32, #tpu.memory_space<vmem>>, %arg3: memref<128x128xbf16, #tpu.memory_space<vmem>>, %arg4: memref<1x128xf32, #tpu.memory_space<vmem>>, %arg5: memref<128x128xbf16, #tpu.memory_space<vmem>>, %arg6: memref<1x128xf32, #tpu.memory_space<vmem>>, %arg7: memref<8x128xf32, #tpu.memory_space<vmem>>) attributes {dimension_semantics = [], scalar_prefetch = 0 : i64, scratch_operands = 0 : i64, tpu.core_type = #tpu.core_type<tc>} {
    %c0 = arith.constant 0 : index
    %c0_0 = arith.constant 0 : index
    %0 = vector.load %arg0[%c0, %c0_0] : memref<8x16xf32, #tpu.memory_space<vmem>>, vector<8x16xf32>
    %1 = arith.truncf %0 : vector<8x16xf32> to vector<8x16xbf16>
    %c0_1 = arith.constant 0 : index
    %c0_2 = arith.constant 0 : index
    %2 = vector.load %arg2[%c0_1, %c0_2] : memref<1x128xf32, #tpu.memory_space<vmem>>, vector<1x128xf32>
    %c0_3 = arith.constant 0 : index
    %c0_4 = arith.constant 0 : index
    %3 = vector.load %arg4[%c0_3, %c0_4] : memref<1x128xf32, #tpu.memory_space<vmem>>, vector<1x128xf32>
    %c0_5 = arith.constant 0 : index
    %c0_6 = arith.constant 0 : index
    %4 = vector.load %arg6[%c0_5, %c0_6] : memref<1x128xf32, #tpu.memory_space<vmem>>, vector<1x128xf32>
    %c0_7 = arith.constant 0 : index
    %c0_8 = arith.constant 0 : index
    %5 = vector.load %arg1[%c0_7, %c0_8] : memref<16x128xbf16, #tpu.memory_space<vmem>>, vector<16x128xbf16>
    %cst = arith.constant dense<0.000000e+00> : vector<8x128xf32>
    %6 = tpu.matmul %1, %5, %cst {dimension_numbers = #tpu.dot_dimension_numbers<[1], [0], [0], [1], [0, 0, 1, 1], [], []>} : vector<8x16xbf16>, vector<16x128xbf16>, vector<8x128xf32> -> vector<8x128xf32>
    %7 = vector.broadcast %2 : vector<1x128xf32> to vector<8x128xf32>
    %8 = arith.addf %6, %7 : vector<8x128xf32>
    %cst_9 = arith.constant 0.000000e+00 : f32
    %9 = vector.broadcast %cst_9 : f32 to vector<8x128xf32>
    %10 = arith.maximumf %8, %9 : vector<8x128xf32>
    %11 = arith.truncf %10 : vector<8x128xf32> to vector<8x128xbf16>
    %c0_10 = arith.constant 0 : index
    %c0_11 = arith.constant 0 : index
    %12 = vector.load %arg3[%c0_10, %c0_11] : memref<128x128xbf16, #tpu.memory_space<vmem>>, vector<128x128xbf16>
    %cst_12 = arith.constant dense<0.000000e+00> : vector<8x128xf32>
    %13 = tpu.matmul %11, %12, %cst_12 {dimension_numbers = #tpu.dot_dimension_numbers<[1], [0], [0], [1], [0, 0, 1, 1], [], []>} : vector<8x128xbf16>, vector<128x128xbf16>, vector<8x128xf32> -> vector<8x128xf32>
    %14 = vector.broadcast %3 : vector<1x128xf32> to vector<8x128xf32>
    %15 = arith.addf %13, %14 : vector<8x128xf32>
    %cst_13 = arith.constant 0.000000e+00 : f32
    %16 = vector.broadcast %cst_13 : f32 to vector<8x128xf32>
    %17 = arith.maximumf %15, %16 : vector<8x128xf32>
    %18 = arith.truncf %17 : vector<8x128xf32> to vector<8x128xbf16>
    %c0_14 = arith.constant 0 : index
    %c0_15 = arith.constant 0 : index
    %19 = vector.load %arg5[%c0_14, %c0_15] : memref<128x128xbf16, #tpu.memory_space<vmem>>, vector<128x128xbf16>
    %cst_16 = arith.constant dense<0.000000e+00> : vector<8x128xf32>
    %20 = tpu.matmul %18, %19, %cst_16 {dimension_numbers = #tpu.dot_dimension_numbers<[1], [0], [0], [1], [0, 0, 1, 1], [], []>} : vector<8x128xbf16>, vector<128x128xbf16>, vector<8x128xf32> -> vector<8x128xf32>
    %21 = vector.broadcast %4 : vector<1x128xf32> to vector<8x128xf32>
    %22 = arith.addf %20, %21 : vector<8x128xf32>
    %cst_17 = arith.constant dense<0xFF800000> : vector<128xf32>
    %23 = vector.multi_reduction <maximumf>, %22, %cst_17 [0] : vector<8x128xf32> to vector<128xf32>
    %24 = vector.shape_cast %23 : vector<128xf32> to vector<1x128xf32>
    %25 = vector.broadcast %24 : vector<1x128xf32> to vector<8x128xf32>
    %26 = arith.subf %22, %25 : vector<8x128xf32>
    %27 = math.exp %26 : vector<8x128xf32>
    %cst_18 = arith.constant dense<0.000000e+00> : vector<128xf32>
    %28 = vector.multi_reduction <add>, %27, %cst_18 [0] : vector<8x128xf32> to vector<128xf32>
    %29 = vector.shape_cast %28 : vector<128xf32> to vector<1x128xf32>
    %cst_19 = arith.constant 1.000000e+00 : f32
    %30 = vector.broadcast %cst_19 : f32 to vector<1x128xf32>
    %31 = arith.divf %30, %29 : vector<1x128xf32>
    %32 = vector.broadcast %31 : vector<1x128xf32> to vector<8x128xf32>
    %33 = arith.mulf %27, %32 : vector<8x128xf32>
    %c0_20 = arith.constant 0 : index
    %c0_21 = arith.constant 0 : index
    %34 = vector.load %arg7[%c0_20, %c0_21] : memref<8x128xf32, #tpu.memory_space<vmem>>, vector<8x128xf32>
    tpu.vector_store %arg7[%c0_20, %c0_21], %33 {strides = array<i32>} : memref<8x128xf32, #tpu.memory_space<vmem>>, vector<8x128xf32>,
    return
  }
}

</mosaic_0001>

<bundles_post_ra>
// kernel: master_policy_forward.1
= control target key start
LH: loop header
LB: loop body
LE: loop exit
PB: predicated region body
PF: predicated region fallthrough
CT: control target
= control target key end

     0   :  { %12 = vsyncpa [#allocation3], 0  ;;  %s733_s0 = inlined_call_operand.hbm [shape: f32[8,16], index: 0, kind: input, shape index: {}]   ;;  %s734_s1 = inlined_call_operand.vmem [shape: bf16[16,128], index: 1, kind: input, shape index: {}]   ;;  %s735_s2 = inlined_call_operand.vmem [shape: f32[1,128], index: 2, kind: input, shape index: {}]   ;;  %s736_s3 = inlined_call_operand.hbm [shape: bf16[128,128], index: 3, kind: input, shape index: {}]   ;;  %s737_s4 = inlined_call_operand.vmem [shape: f32[1,128], index: 4, kind: input, shape index: {}]   ;;  %s738_s5 = inlined_call_operand.hbm [shape: bf16[128,128], index: 5, kind: input, shape index: {}]   ;;  %s739_s6 = inlined_call_operand.vmem [shape: f32[1,128], index: 6, kind: input, shape index: {}]   ;;  %s740_s7 = inlined_call_operand.hbm [shape: f32[8,128], index: 7, kind: output, shape index: {}]  }
   0x1   :  { %13 = vsyncpa [#allocation6], 0 }
   0x2   :  { %14 = vsyncpa [#allocation4], 0  ;;  %s599_s24 = smov [#allocation5]   ;;  %s505_s28 = scalar_lea.hbm %s736_s3, 1024 }
   0x3   :  { %s34_s25 = sshll.u32 %s599_s24, 4  ;;  %p506_p0 = scmp.ne.s32.totalorder %s736_s3, %s505_s28  ;;  %s35_s25 = int_to_ptr.vmem [resolvable:$true] %s34_s25 }
   0x4   :  { %p509_p1 = scmp.lt.u32.totalorder %s505_s28, %s736_s3 }
   0x6   :  { %p511_p2 = pnand %p509_p1, %p506_p0 }
   0x8   :  { %514 = shalt.err (!%p511_p2)
}
   0x9   :  { %s515_s10 = scalar_lea.vmem %s35_s25, 1024  ;;  %p520_p4 = scmp.lt.s32.totalorder %s35_s25, %s35_s25 }
   0xa   :  { %p516_p3 = scmp.ne.s32.totalorder %s35_s25, %s515_s10  ;;  %p521_p5 = scmp.lt.s32.totalorder %s515_s10, %s515_s10 }
   0xc   :  { %p522_p6 = por %p521_p5, %p520_p4 }
   0xe   :  { %p523_p7 = pnand %p522_p6, %p516_p3 }
  0x10   :  { %526 = shalt.err (!%p523_p7)
}
  0x11   :  { %s600_s11 = smov 64   ;;  %s601_s12 = smov 4  }
  0x12   :  { %40 = dma.hbm_to_vmem [thread:$0]  %s736_s3, 1024, %s35_s25, [#allocation6], %s600_s11, %s600_s11, %s601_s12  }
  0x13   :  { %s602_s15 = smov [#allocation2]   ;;  %s603_s17 = smov [#allocation7]  }
  0x14   :  { %s21_s16 = sshll.u32 %s602_s15, 4  ;;  %s48_s18 = sshll.u32 %s603_s17, 4  ;;  %s22_s16 = int_to_ptr.vmem [resolvable:$true] %s21_s16  ;;  %s49_s18 = int_to_ptr.vmem [resolvable:$true] %s48_s18 }
  0x15   :  { %s527_s21 = scalar_lea.hbm %s733_s0, 128 }
  0x16   :  { %p528_p8 = scmp.ne.s32.totalorder %s733_s0, %s527_s21  ;;  %p531_p9 = scmp.lt.u32.totalorder %s527_s21, %s733_s0 }
  0x18   :  { %p533_p10 = pnand %p531_p9, %p528_p8 }
  0x1a   :  { %536 = shalt.err (!%p533_p10)
}
  0x1b   :  { %s537_s3 = scalar_lea.vmem %s22_s16, 128  ;;  %p542_p12 = scmp.lt.s32.totalorder %s22_s16, %s22_s16 }
  0x1c   :  { %p538_p11 = scmp.ne.s32.totalorder %s22_s16, %s537_s3  ;;  %p543_p13 = scmp.lt.s32.totalorder %s537_s3, %s537_s3 }
  0x1e   :  { %p544_p0 = por %p543_p13, %p542_p12 }
  0x20   :  { %p545_p1 = pnand %p544_p0, %p538_p11 }
  0x22   :  { %548 = shalt.err (!%p545_p1)
}
  0x23   :  { %24 = dma.hbm_to_vmem [thread:$0]  %s733_s0, 128, %s22_s16, [#allocation3]  }
  0x24   :  { %s549_s30 = scalar_lea.hbm %s738_s5, 1024 }
  0x25   :  { %p550_p2 = scmp.ne.s32.totalorder %s738_s5, %s549_s30  ;;  %p553_p3 = scmp.lt.u32.totalorder %s549_s30, %s738_s5 }
  0x27   :  { %p555_p4 = pnand %p553_p3, %p550_p2 }
  0x29   :  { %558 = shalt.err (!%p555_p4)
}
  0x2a   :  { %s559_s14 = scalar_lea.vmem %s49_s18, 1024  ;;  %p564_p6 = scmp.lt.s32.totalorder %s49_s18, %s49_s18 }
  0x2b   :  { %p560_p5 = scmp.ne.s32.totalorder %s49_s18, %s559_s14  ;;  %p565_p7 = scmp.lt.s32.totalorder %s559_s14, %s559_s14 }
  0x2d   :  { %p566_p8 = por %p565_p7, %p564_p6 }
  0x2f   :  { %p567_p9 = pnand %p566_p8, %p560_p5 }
  0x31   :  { %570 = shalt.err (!%p567_p9)
}
  0x32   :  { %54 = dma.hbm_to_vmem [thread:$0]  %s738_s5, 1024, %s49_s18, [#allocation6], %s600_s11, %s600_s11, %s601_s12  }
  0x33   :  { %593 = dma.done.wait [#allocation3], 128  }
  0x34   :  { %594 = vsyncadd [#allocation3], 4294967168 }
  0x35   :  { %595 = dma.done.wait [#allocation6], 2048  }
  0x36   :  { %596 = vsyncadd [#allocation6], 4294965248  ;;  %v604_v0 = vmov 0.0   ;;  %vm605_vm0 = vmmov 0   ;;  %v484_v1 = vld [vmem:[%s734_s1] sm:$0xff]   ;;  %vm86_vm1 = vcmask 130048  }
  0x37   :  { %430 = vmatprep.subr.bf16.mxu0 %v604_v0  ;;  %432 = vmatprep.mubr.msk.bf16.mxu0 %vm605_vm0, %v604_v0  ;;  %v67_v2 = vld [vmem:[#allocation2] sm:$0xff]  ;;  %v485_v4 = vld [vmem:[#allocation5] sm:$0xff]   ;;  %v486_v5 = vld [vmem:[#allocation5 + $0x8] sm:$0xff]  }
  0x38   :  { %436 = vmatprep.subr.bf16.mxu1 %v604_v0  ;;  %452 = vmatprep.mubr.msk.bf16.mxu1 %vm605_vm0, %v604_v0  ;;  %v68_v3 = vpack.c.bf16 %v67_v2, %v67_v2  ;;  %v487_v6 = vld [vmem:[#allocation5 + $0x10] sm:$0xff]   ;;  %v488_v7 = vld [vmem:[#allocation5 + $0x18] sm:$0xff]   ;;  %v489_v8 = vld [vmem:[#allocation5 + $0x20] sm:$0xff]  }
  0x39   :  { %431 = vmatpush3.bf16.msra.mxu0 %v484_v1  ;;  %437 = vmatpush3.bf16.msra.mxu1 %v485_v4  ;;  %v490_v9 = vld [vmem:[#allocation5 + $0x28] sm:$0xff]   ;;  %v491_v10 = vld [vmem:[#allocation5 + $0x30] sm:$0xff]   ;;  %v492_v11 = vld [vmem:[#allocation5 + $0x38] sm:$0xff]  }
  0x3a   :  { %456 = vmatprep.subr.bf16.mxu0 %v604_v0  ;;  %438 = vmatprep.subr.bf16.mxu1 %v604_v0  ;;  %v493_v12 = vld [vmem:[#allocation7] sm:$0xff]   ;;  %v494_v13 = vld [vmem:[#allocation7 + $0x8] sm:$0xff]   ;;  %v495_v14 = vld [vmem:[#allocation7 + $0x10] sm:$0xff]  }
  0x3b   :  { %v496_v15 = vld [vmem:[#allocation7 + $0x18] sm:$0xff]   ;;  %v497_v16 = vld [vmem:[#allocation7 + $0x20] sm:$0xff]   ;;  %v498_v17 = vld [vmem:[#allocation7 + $0x28] sm:$0xff]  }
  0x3c   :  { %433 = vmatmul.mubr.msk.bf16.vlgmr.msra.gmra.mrb[0].mxu0 %vm86_vm1, %v68_v3  ;;  %v389_v18 = vld [vmem:[%s735_s2] ss:$0 sm:$0xff]  ;;  %v499_v26 = vld [vmem:[#allocation7 + $0x30] sm:$0xff]  }
  0x3d   :  { %472 = vmatprep.mubr.msk.bf16.mxu0 %vm605_vm0, %v604_v0  ;;  %439 = vmatpush3.bf16.msra.mxu1 %v486_v5  ;;  %v500_v27 = vld [vmem:[#allocation7 + $0x38] sm:$0xff]  }
  0x3e   :  { %440 = vmatprep.subr.bf16.mxu1 %v604_v0  ;;  %457 = vmatpush3.bf16.msra.mxu0 %v493_v12  ;;  %v392_v28 = vld [vmem:[%s737_s4] ss:$0 sm:$0xff]  ;;  %s606_s4 = smov [#allocation8]  }
  0x3f   :  { %458 = vmatprep.subr.bf16.mxu0 %v604_v0  ;;  %v401_v36 = vld [vmem:[%s739_s6] ss:$0 sm:$0xff]  ;;  %s379_s6 = sshll.u32 %s606_s4, 4  ;;  %s380_s6 = int_to_ptr.vmem [resolvable:$true] %s379_s6 }
  0x40   :  { %s571_s19 = scalar_lea.vmem %s380_s6, 128  ;;  %p576_p11 = scmp.lt.s32.totalorder %s380_s6, %s380_s6 }
  0x41   :  { %441 = vmatpush3.bf16.msra.mxu1 %v487_v6  ;;  %p572_p10 = scmp.ne.s32.totalorder %s380_s6, %s571_s19  ;;  %p577_p12 = scmp.lt.s32.totalorder %s571_s19, %s571_s19 }
  0x42   :  { %442 = vmatprep.subr.bf16.mxu1 %v604_v0  ;;  %459 = vmatpush3.bf16.msra.mxu0 %v494_v13 }
  0x43   :  { %460 = vmatprep.subr.bf16.mxu0 %v604_v0  ;;  %p578_p13 = por %p577_p12, %p576_p11 }
  0x45   :  { %443 = vmatpush3.bf16.msra.mxu1 %v488_v7  ;;  %p579_p0 = pnand %p578_p13, %p572_p10 }
  0x46   :  { %444 = vmatprep.subr.bf16.mxu1 %v604_v0  ;;  %461 = vmatpush3.bf16.msra.mxu0 %v495_v14 }
  0x47   :  { %462 = vmatprep.subr.bf16.mxu0 %v604_v0 }
  0x49   :  { %445 = vmatpush3.bf16.msra.mxu1 %v489_v8 }
  0x4a   :  { %446 = vmatprep.subr.bf16.mxu1 %v604_v0  ;;  %463 = vmatpush3.bf16.msra.mxu0 %v496_v15 }
  0x4b   :  { %464 = vmatprep.subr.bf16.mxu0 %v604_v0 }
  0x4d   :  { %447 = vmatpush3.bf16.msra.mxu1 %v490_v9 }
  0x4e   :  { %448 = vmatprep.subr.bf16.mxu1 %v604_v0  ;;  %465 = vmatpush3.bf16.msra.mxu0 %v497_v16 }
  0x4f   :  { %466 = vmatprep.subr.bf16.mxu0 %v604_v0 }
  0x51   :  { %449 = vmatpush3.bf16.msra.mxu1 %v491_v10 }
  0x52   :  { %450 = vmatprep.subr.bf16.mxu1 %v604_v0  ;;  %467 = vmatpush3.bf16.msra.mxu0 %v498_v17 }
  0x53   :  { %468 = vmatprep.subr.bf16.mxu0 %v604_v0 }
  0x55   :  { %451 = vmatpush3.bf16.msra.mxu1 %v492_v11 }
  0x56   :  { %469 = vmatpush3.bf16.msra.mxu0 %v499_v26 }
  0x57   :  { %470 = vmatprep.subr.bf16.mxu0 %v604_v0 }
  0x5a   :  { %471 = vmatpush3.bf16.msra.mxu0 %v500_v27 }
 0x10f   :  { %v124_v19 = vpop.f32.mrb[0].mxu0 }
 0x110   :  { %v125_v20 = vadd.f32 %v389_v18, %v124_v19  ;;  %v434_v21 = vpop.f32.mrb[1].mxu0 }
 0x111   :  { %v127_v22 = vpop.f32.mrb[2].mxu0 }
 0x112   :  { %v130_v23 = vmax.f32 %v125_v20, 0.0  ;;  %v435_v24 = vpop.f32.mrb[3].mxu0 }
 0x114   :  { %v131_v25 = vpack.c.bf16 %v130_v23, %v130_v23 }
 0x116   :  { %453 = vmatmul.mubr.bf16.vlgmr.msra.gmra.mrb[0].mxu1 %v131_v25 }
 0x1e9   :  { %v236_v29 = vpop.f32.mrb[0].mxu1 }
 0x1ea   :  { %v237_v30 = vadd.f32 %v392_v28, %v236_v29  ;;  %v454_v31 = vpop.f32.mrb[1].mxu1 }
 0x1eb   :  { %v239_v32 = vpop.f32.mrb[2].mxu1 }
 0x1ec   :  { %v242_v33 = vmax.f32 %v237_v30, 0.0  ;;  %v455_v34 = vpop.f32.mrb[3].mxu1 }
 0x1ee   :  { %v243_v35 = vpack.c.bf16 %v242_v33, %v242_v33 }
 0x1f0   :  { %473 = vmatmul.mubr.bf16.vlgmr.msra.gmra.mrb[4].mxu0 %v243_v35 }
 0x2c3   :  { %v348_v37 = vpop.f32.mrb[4].mxu0 }
 0x2c4   :  { %v349_v38 = vadd.f32 %v401_v36, %v348_v37  ;;  %v474_v39 = vpop.f32.mrb[5].mxu0 }
 0x2c5   :  { %v351_v40 = vpop.f32.mrb[6].mxu0 }
 0x2c6   :  { %v354_v41 = vrot.slane %v349_v38, 4  ;;  %v475_v42 = vpop.f32.mrb[7].mxu0 }
 0x2c8   :  { %v355_v43 = vmax.f32 %v349_v38, %v354_v41 }
 0x2ca   :  { %v356_v44 = vrot.slane %v355_v43, 2 }
 0x2cc   :  { %v357_v45 = vmax.f32 %v355_v43, %v356_v44 }
 0x2ce   :  { %v358_v46 = vrot.slane %v357_v45, 1 }
 0x2d0   :  { %v359_v47 = vmax.f32 %v357_v45, %v358_v46 }
 0x2d2   :  { %v360_v48 = vsub.f32 %v349_v38, %v359_v47 }
 0x2d4   :  { %v361_v49 = vmul.f32 1.442695, %v360_v48 }
 0x2d6   :  { %501 = vpow2.f32 %v361_v49 }
 0x2e0   :  { %v502_v50 = vpop.eup %501 }
 0x2e1   :  { %v363_v51 = vrot.slane %v502_v50, 4 }
 0x2e3   :  { %v364_v52 = vadd.f32 %v502_v50, %v363_v51 }
 0x2e5   :  { %v365_v53 = vrot.slane %v364_v52, 2 }
 0x2e7   :  { %v366_v54 = vadd.f32 %v365_v53, %v364_v52 }
 0x2e9   :  { %v367_v55 = vrot.slane %v366_v54, 1 }
 0x2eb   :  { %v368_v56 = vadd.f32 %v367_v55, %v366_v54 }
 0x2ed   :  { %503 = vrcp.f32 %v368_v56 }
 0x2f7   :  { %v504_v57 = vpop.eup %503 }
 0x2f8   :  { %v371_v58 = vmul.f32 %v504_v57, %v502_v50 }
 0x2fa   :  { %372 = vst [vmem:[#allocation8] sm:$0xff] %v371_v58 }
 0x2fb   :  { %582 = shalt.err (!%p579_p0)
}
 0x2fc   :  { %s583_s22 = scalar_lea.hbm %s740_s7, 128 }
 0x2fd   :  { %p584_p1 = scmp.ne.s32.totalorder %s740_s7, %s583_s22  ;;  %p587_p2 = scmp.lt.u32.totalorder %s583_s22, %s740_s7 }
 0x2ff   :  { %p589_p3 = pnand %p587_p2, %p584_p1 }
 0x301   :  { %592 = shalt.err (!%p589_p3)
}
 0x302   :  { %382 = dma.vmem_to_hbm [thread:$0]  %s380_s6, 128, %s740_s7, [#allocation4]  }
 0x303   :  { %597 = dma.done.wait [#allocation4], 128  }
 0x304   :  { %598 = vsyncadd [#allocation4], 4294967168 }
 0x305   :  { %386 = vsyncpa [#allocation3], 1 }
 0x306   :  { %387 = vsyncpa [#allocation6], 1 }
 0x307   :  { %388 = vsyncpa [#allocation4], 1 }

</bundles_post_ra>
